<compile_context>
chip_gen: v5e
topology: v5e:2x2
jax: 0.10.0
libtpu: 0.0.40
codegen_flags: <defaults>
</compile_context>

<pallas_src>
import jax
import jax.numpy as jnp
from jax.experimental import pallas as pl
from jax.experimental.pallas import tpu as pltpu


def _round_up(n, m):
    return ((n + m - 1) // m) * m


def value_net_kernel(x_ref, w1_ref, b1_ref, w2_ref, b2_ref, w3_ref, b3_ref, o_ref):
    """fc1 -> ReLU -> fc2 -> ReLU -> fc3 on one (TB, obs_dim) batch tile.

    Weights are (in, out) so the hot path is plain MXU matmuls with f32
    accumulation; bias/ReLU stay f32.  fc3 has a single output column, so it is
    done as a broadcast-multiply + lane reduction (VPU/XLU) instead of a
    1/256-utilized MXU matmul.
    """
    x = x_ref[...]
    h1 = jnp.dot(x, w1_ref[...], preferred_element_type=jnp.float32) + b1_ref[...]
    h1 = jnp.maximum(h1, 0.0)
    h2 = jnp.dot(h1.astype(w2_ref.dtype), w2_ref[...],
                 preferred_element_type=jnp.float32) + b2_ref[...]
    h2 = jnp.maximum(h2, 0.0)
    o_ref[...] = jnp.sum(h2 * w3_ref[...], axis=-1, keepdims=True) + b3_ref[...]


def value_net_forward(x, context, params, *, block_b=512, use_bf16=False):
    """Wrapper: fold the context into fc1's bias, then run the batch-tiled MLP kernel.

    params = (w1t, b1, w2t, b2, w3t, b3) with weights stored transposed (in, out),
    where w1t has shape (obs_dim + ctx_dim, 128) exactly like the PyTorch fc1.
    Set use_bf16=True on v6e/v7x for the bf16-operand / f32-accumulate fast path;
    keep False on v5e.
    """
    w1t, b1, w2t, b2, w3t, b3 = params
    B, obs_dim = x.shape
    ctx = context.reshape(1, -1).astype(jnp.float32)
    ctx_dim = ctx.shape[-1]
    assert w1t.shape[0] == obs_dim + ctx_dim, "fc1 input dim must be obs_dim + ctx_dim"
    hid1 = w1t.shape[1]
    hid2 = w2t.shape[1]

    # --- context fold: b1_eff = context @ W1_ctx + b1 (independent of x) ---
    w1x = w1t[:obs_dim]                       # (obs_dim, 128)
    w1c = w1t[obs_dim:]                       # (ctx_dim, 128)
    b1_eff = ctx @ w1c + b1                   # (1, 128), f32

    # --- batch tiling (pad B up to a multiple of the tile) ---
    align = 16 if use_bf16 else 8
    tb = max(align, min(_round_up(block_b, align), _round_up(B, align)))
    bp = _round_up(B, tb)
    if bp != B:
        x = jnp.pad(x, ((0, bp - B), (0, 0)))

    mm_dtype = jnp.bfloat16 if use_bf16 else jnp.float32
    xk = x if x.dtype == mm_dtype else x.astype(mm_dtype)
    w1k = w1x if w1x.dtype == mm_dtype else w1x.astype(mm_dtype)
    w2k = w2t if w2t.dtype == mm_dtype else w2t.astype(mm_dtype)
    w3_row = w3t.reshape(1, hid2).astype(jnp.float32)   # (1, 64)
    b3r = b3.reshape(1, 1).astype(jnp.float32)

    itemsize = 2 if use_bf16 else 4
    flops = int(2 * bp * (obs_dim * hid1 + hid1 * hid2 + hid2))
    bytes_accessed = int(
        bp * obs_dim * itemsize                 # x stream
        + bp * 1 * 4                            # output
        + (obs_dim * hid1 + hid1 * hid2) * itemsize
        + (hid1 + hid2 + hid2 + 1) * 4          # biases + w3 row
    )

    resident = lambda i: (0, 0)
    out = pl.pallas_call(
        value_net_kernel,
        out_shape=jax.ShapeDtypeStruct((bp, 1), jnp.float32),
        grid=(bp // tb,),
        in_specs=[
            pl.BlockSpec((tb, obs_dim), lambda i: (i, 0)),   # x        (streamed)
            pl.BlockSpec((obs_dim, hid1), resident),         # W1_x     (resident)
            pl.BlockSpec((1, hid1), resident),               # b1_eff   (resident)
            pl.BlockSpec((hid1, hid2), resident),            # W2       (resident)
            pl.BlockSpec((1, hid2), resident),               # b2       (resident)
            pl.BlockSpec((1, hid2), resident),               # w3 row   (resident)
            pl.BlockSpec((1, 1), resident),                  # b3       (resident)
        ],
        out_specs=pl.BlockSpec((tb, 1), lambda i: (i, 0)),
        compiler_params=pltpu.CompilerParams(
            dimension_semantics=("parallel",)),
        cost_estimate=pl.CostEstimate(
            flops=flops, transcendentals=0, bytes_accessed=bytes_accessed),
    )(xk, w1k, b1_eff, w2k, b2, w3_row, b3r)
    return out[:B]


def init_linear_params(key, in_dim, out_dim):
    """Deterministic PyTorch-style Linear init: U(-1/sqrt(in), 1/sqrt(in))."""
    k_w, k_b = jax.random.split(key)
    bound = 1.0 / jnp.sqrt(jnp.float32(in_dim))
    # stored transposed: (in_dim, out_dim)
    w_t = jax.random.uniform(k_w, (in_dim, out_dim), jnp.float32, -bound, bound)
    b = jax.random.uniform(k_b, (1, out_dim), jnp.float32, -bound, bound)
    return w_t, b


def reference_forward(x, context, params):
    """Pure-JAX reference mirroring the PyTorch module (concat + 3 Linears)."""
    B = x.shape[0]
    ctx = jnp.broadcast_to(context.reshape(1, -1), (B, context.shape[-1]))
    xc = jnp.concatenate([x, ctx], axis=-1)
    w1t, b1, w2t, b2, w3t, b3 = params
    h1 = jnp.maximum(xc @ w1t + b1, 0.0)
    h2 = jnp.maximum(h1 @ w2t + b2, 0.0)
    return h2 @ w3t + b3


if __name__ == "__main__":
    key = jax.random.PRNGKey(0)
    k_x, k_ctx, k_x2, k1, k2, k3 = jax.random.split(key, 6)

    # Small shapes consistent with the module.
    B = 8            # batch
    obs_dim = 12     # raw observation features
    ctx_dim = 4      # context length
    state_dim = obs_dim + ctx_dim  # fc1 input dim (as in the original module)

    x = jax.random.normal(k_x, (B, obs_dim), jnp.float32)
    context = jax.random.normal(k_ctx, (ctx_dim,), jnp.float32)

    params = (
        *init_linear_params(k1, state_dim, 128),   # fc1
        *init_linear_params(k2, 128, 64),          # fc2
        *init_linear_params(k3, 64, 1),            # fc3
    )

    ref = reference_forward(x, context, params)

    # f32 path (exact vs. reference).
    out = jax.block_until_ready(value_net_forward(x, context, params))
    assert out.shape == (B, 1)
    assert jnp.allclose(out, ref, atol=1e-5, rtol=1e-5), "f32 mismatch vs reference"

    # bf16-matmul fast path (v6e/v7x); f32 accumulation, looser tolerance.
    out_bf16 = jax.block_until_ready(
        value_net_forward(x, context, params, use_bf16=True))
    assert out_bf16.shape == (B, 1)
    assert jnp.allclose(out_bf16, ref, atol=5e-2, rtol=5e-2), "bf16 mismatch vs reference"

    # Multi-step grid + batch padding path (B not a multiple of the tile).
    B2 = 40
    x2 = jax.random.normal(k_x2, (B2, obs_dim), jnp.float32)
    out2 = jax.block_until_ready(value_net_forward(x2, context, params, block_b=16))
    ref2 = reference_forward(x2, context, params)
    assert out2.shape == (B2, 1)
    assert jnp.allclose(out2, ref2, atol=1e-5, rtol=1e-5), "tiled-grid mismatch vs reference"

    print("KERNEL_OK")
</pallas_src>

<mosaic_0001>
module attributes {stable_mosaic.version = 11 : i64} {
  func.func @value_net_kernel(%arg0: i32, %arg1: memref<8x12xf32, #tpu.memory_space<vmem>>, %arg2: memref<12x128xf32, #tpu.memory_space<vmem>>, %arg3: memref<1x128xf32, #tpu.memory_space<vmem>>, %arg4: memref<128x64xf32, #tpu.memory_space<vmem>>, %arg5: memref<1x64xf32, #tpu.memory_space<vmem>>, %arg6: memref<1x64xf32, #tpu.memory_space<vmem>>, %arg7: memref<1x1xf32, #tpu.memory_space<vmem>>, %arg8: memref<8x1xf32, #tpu.memory_space<vmem>>) attributes {dimension_semantics = [#tpu.dimension_semantics<parallel>], iteration_bounds = array<i64: 1>, scalar_prefetch = 0 : i64, scratch_operands = 0 : i64, tpu.core_type = #tpu.core_type<tc>, window_params = [{transform_indices = @transform_0, window_bounds = array<i64: 8, 12>}, {pipeline_mode = #tpu.pipeline_mode<synchronous>, transform_indices = @transform_1, window_bounds = array<i64: 12, 128>}, {pipeline_mode = #tpu.pipeline_mode<synchronous>, transform_indices = @transform_2, window_bounds = array<i64: 1, 128>}, {pipeline_mode = #tpu.pipeline_mode<synchronous>, transform_indices = @transform_3, window_bounds = array<i64: 128, 64>}, {pipeline_mode = #tpu.pipeline_mode<synchronous>, transform_indices = @transform_4, window_bounds = array<i64: 1, 64>}, {pipeline_mode = #tpu.pipeline_mode<synchronous>, transform_indices = @transform_5, window_bounds = array<i64: 1, 64>}, {pipeline_mode = #tpu.pipeline_mode<synchronous>, transform_indices = @transform_6, window_bounds = array<i64: 1, 1>}, {transform_indices = @transform_7, window_bounds = array<i64: 8, 1>}]} {
    %c0 = arith.constant 0 : index
    %c0_0 = arith.constant 0 : index
    %0 = vector.load %arg1[%c0, %c0_0] : memref<8x12xf32, #tpu.memory_space<vmem>>, vector<8x12xf32>
    %c0_1 = arith.constant 0 : index
    %c0_2 = arith.constant 0 : index
    %1 = vector.load %arg2[%c0_1, %c0_2] : memref<12x128xf32, #tpu.memory_space<vmem>>, vector<12x128xf32>
    %cst = arith.constant dense<0.000000e+00> : vector<8x128xf32>
    %2 = tpu.matmul %0, %1, %cst {dimension_numbers = #tpu.dot_dimension_numbers<[1], [0], [0], [1], [0, 0, 1, 1], [], []>} : vector<8x12xf32>, vector<12x128xf32>, vector<8x128xf32> -> vector<8x128xf32>
    %c0_3 = arith.constant 0 : index
    %c0_4 = arith.constant 0 : index
    %3 = vector.load %arg3[%c0_3, %c0_4] : memref<1x128xf32, #tpu.memory_space<vmem>>, vector<1x128xf32>
    %4 = vector.broadcast %3 : vector<1x128xf32> to vector<8x128xf32>
    %5 = arith.addf %2, %4 : vector<8x128xf32>
    %cst_5 = arith.constant 0.000000e+00 : f32
    %6 = vector.broadcast %cst_5 : f32 to vector<8x128xf32>
    %7 = arith.maximumf %5, %6 : vector<8x128xf32>
    %c0_6 = arith.constant 0 : index
    %c0_7 = arith.constant 0 : index
    %8 = vector.load %arg4[%c0_6, %c0_7] : memref<128x64xf32, #tpu.memory_space<vmem>>, vector<128x64xf32>
    %cst_8 = arith.constant dense<0.000000e+00> : vector<8x64xf32>
    %9 = tpu.matmul %7, %8, %cst_8 {dimension_numbers = #tpu.dot_dimension_numbers<[1], [0], [0], [1], [0, 0, 1, 1], [], []>} : vector<8x128xf32>, vector<128x64xf32>, vector<8x64xf32> -> vector<8x64xf32>
    %c0_9 = arith.constant 0 : index
    %c0_10 = arith.constant 0 : index
    %10 = vector.load %arg5[%c0_9, %c0_10] : memref<1x64xf32, #tpu.memory_space<vmem>>, vector<1x64xf32>
    %11 = vector.broadcast %10 : vector<1x64xf32> to vector<8x64xf32>
    %12 = arith.addf %9, %11 : vector<8x64xf32>
    %cst_11 = arith.constant 0.000000e+00 : f32
    %13 = vector.broadcast %cst_11 : f32 to vector<8x64xf32>
    %14 = arith.maximumf %12, %13 : vector<8x64xf32>
    %c0_12 = arith.constant 0 : index
    %c0_13 = arith.constant 0 : index
    %15 = vector.load %arg6[%c0_12, %c0_13] : memref<1x64xf32, #tpu.memory_space<vmem>>, vector<1x64xf32>
    %16 = vector.broadcast %15 : vector<1x64xf32> to vector<8x64xf32>
    %17 = arith.mulf %14, %16 : vector<8x64xf32>
    %cst_14 = arith.constant dense<0.000000e+00> : vector<8xf32>
    %18 = vector.multi_reduction <add>, %17, %cst_14 [1] : vector<8x64xf32> to vector<8xf32>
    %19 = vector.shape_cast %18 : vector<8xf32> to vector<8x1xf32>
    %c0_15 = arith.constant 0 : index
    %c0_16 = arith.constant 0 : index
    %20 = vector.load %arg7[%c0_15, %c0_16] : memref<1x1xf32, #tpu.memory_space<vmem>>, vector<1x1xf32>
    %21 = vector.broadcast %20 : vector<1x1xf32> to vector<8x1xf32>
    %22 = arith.addf %19, %21 : vector<8x1xf32>
    %c0_17 = arith.constant 0 : index
    %c0_18 = arith.constant 0 : index
    %23 = vector.load %arg8[%c0_17, %c0_18] : memref<8x1xf32, #tpu.memory_space<vmem>>, vector<8x1xf32>
    tpu.vector_store %arg8[%c0_17, %c0_18], %22 {strides = array<i32>} : memref<8x1xf32, #tpu.memory_space<vmem>>, vector<8x1xf32>,
    return
  }
  func.func @transform_0(%arg0: i32) -> (i32, i32) {
    %c0_i32 = arith.constant 0 : i32
    %c0_i32_0 = arith.constant 0 : i32
    return %arg0, %c0_i32 : i32, i32
  }
  func.func @transform_1(%arg0: i32) -> (i32, i32) {
    %c0_i32 = arith.constant 0 : i32
    %c0_i32_0 = arith.constant 0 : i32
    %c0_i32_1 = arith.constant 0 : i32
    return %c0_i32, %c0_i32_0 : i32, i32
  }
  func.func @transform_2(%arg0: i32) -> (i32, i32) {
    %c0_i32 = arith.constant 0 : i32
    %c0_i32_0 = arith.constant 0 : i32
    %c0_i32_1 = arith.constant 0 : i32
    return %c0_i32, %c0_i32_0 : i32, i32
  }
  func.func @transform_3(%arg0: i32) -> (i32, i32) {
    %c0_i32 = arith.constant 0 : i32
    %c0_i32_0 = arith.constant 0 : i32
    %c0_i32_1 = arith.constant 0 : i32
    return %c0_i32, %c0_i32_0 : i32, i32
  }
  func.func @transform_4(%arg0: i32) -> (i32, i32) {
    %c0_i32 = arith.constant 0 : i32
    %c0_i32_0 = arith.constant 0 : i32
    %c0_i32_1 = arith.constant 0 : i32
    return %c0_i32, %c0_i32_0 : i32, i32
  }
  func.func @transform_5(%arg0: i32) -> (i32, i32) {
    %c0_i32 = arith.constant 0 : i32
    %c0_i32_0 = arith.constant 0 : i32
    %c0_i32_1 = arith.constant 0 : i32
    return %c0_i32, %c0_i32_0 : i32, i32
  }
  func.func @transform_6(%arg0: i32) -> (i32, i32) {
    %c0_i32 = arith.constant 0 : i32
    %c0_i32_0 = arith.constant 0 : i32
    %c0_i32_1 = arith.constant 0 : i32
    return %c0_i32, %c0_i32_0 : i32, i32
  }
  func.func @transform_7(%arg0: i32) -> (i32, i32) {
    %c0_i32 = arith.constant 0 : i32
    %c0_i32_0 = arith.constant 0 : i32
    return %arg0, %c0_i32 : i32, i32
  }
}

</mosaic_0001>

<bundles_post_ra>
// kernel: tpu_custom_call.1
= control target key start
LH: loop header
LB: loop body
LE: loop exit
PB: predicated region body
PF: predicated region fallthrough
CT: control target
= control target key end

     0   :  { %vm39_vm0 = vcmask 1043456   ;;  %vm35_vm1 = vcmask 97280   ;;  %vm110_vm2 = vcmask 523264   ;;  %vm119_vm3 = vcmask 7168   ;;  %s243_s1 = inlined_call_operand.vmem [shape: f32[12,128], index: 1, kind: input, shape index: {}]   ;;  %s244_s0 = inlined_call_operand.vmem [shape: f32[8,12], index: 0, kind: input, shape index: {}]   ;;  %s245_s3 = inlined_call_operand.vmem [shape: f32[128,64], index: 3, kind: input, shape index: {}]   ;;  %s246_s2 = inlined_call_operand.vmem [shape: f32[1,128], index: 2, kind: input, shape index: {}]   ;;  %s247_s4 = inlined_call_operand.vmem [shape: f32[1,64], index: 4, kind: input, shape index: {}]   ;;  %s248_s5 = inlined_call_operand.vmem [shape: f32[1,64], index: 5, kind: input, shape index: {}]   ;;  %s249_s6 = inlined_call_operand.<no memory space> [shape: f32[1,1], index: 6, kind: input, shape index: {}]   ;;  %s250_s7 = inlined_call_operand.vmem [shape: f32[8,1], index: 7, kind: output, shape index: {}]  }
   0x1   :  { %v30_v0 = vld [vmem:[%s243_s1 + $0x8] sm:$0xf]  ;;  %v29_v1 = vld [vmem:[%s243_s1] sm:$0xff]  ;;  %v79_v3 = vld [vmem:[%s245_s3 + $0x78] sm:$0xff]  ;;  %v12_v23 = vstv %s249_s6 }
   0x2   :  { %125 = vmatpush.msk.msra.mxu0 %vm39_vm0, %v30_v0  ;;  %v28_v2 = vld [vmem:[%s244_s0] sm:$0xff]  ;;  %v78_v4 = vld [vmem:[%s245_s3 + $0x70] sm:$0xff]  ;;  %84 = vmatpush.msra.mxu1 %v79_v3  ;;  %v77_v5 = vld [vmem:[%s245_s3 + $0x68] sm:$0xff]  ;;  %13 = vst [vmem:[#allocation2] sm:$0x1] %v12_v23 }
   0x3   :  { %v76_v6 = vld [vmem:[%s245_s3 + $0x60] sm:$0xff]  ;;  %v75_v7 = vld [vmem:[%s245_s3 + $0x58] sm:$0xff]  ;;  %v74_v8 = vld [vmem:[%s245_s3 + $0x50] sm:$0xff] }
   0x4   :  { %58 = vmatpush.msra.mxu0 %v29_v1  ;;  %85 = vmatpush.msra.mxu1 %v78_v4  ;;  %v73_v9 = vld [vmem:[%s245_s3 + $0x48] sm:$0xff]  ;;  %v72_v10 = vld [vmem:[%s245_s3 + $0x40] sm:$0xff]  ;;  %v71_v11 = vld [vmem:[%s245_s3 + $0x38] sm:$0xff] }
   0x5   :  { %126 = vmatmul.msk.f32.vlgmr.msra.gmra.mxu0 %vm35_vm1, %v28_v2  ;;  %v70_v12 = vld [vmem:[%s245_s3 + $0x30] sm:$0xff]  ;;  %v69_v13 = vld [vmem:[%s245_s3 + $0x28] sm:$0xff]  ;;  %v68_v14 = vld [vmem:[%s245_s3 + $0x20] sm:$0xff] }
   0x6   :  { %86 = vmatpush.msra.mxu1 %v77_v5  ;;  %v67_v15 = vld [vmem:[%s245_s3 + $0x18] sm:$0xff]  ;;  %v66_v16 = vld [vmem:[%s245_s3 + $0x10] sm:$0xff]  ;;  %v65_v17 = vld [vmem:[%s245_s3 + $0x8] sm:$0xff] }
   0x7   :  { %v64_v18 = vld [vmem:[%s245_s3] sm:$0xff] }
   0x8   :  { %87 = vmatpush.msra.mxu1 %v76_v6  ;;  %v127_v19 = vld [vmem:[%s246_s2] ss:$0 sm:$0xff] }
   0x9   :  { %v128_v24 = vld [vmem:[%s247_s4] ss:$0 sm:$0xff] }
   0xa   :  { %88 = vmatpush.msra.mxu1 %v75_v7  ;;  %v129_v27 = vld [vmem:[%s248_s5] ss:$0 sm:$0xff] }
   0xb   :  { %v130_v31 = vld [vmem:[#allocation2] ss:$0 sm:$0xff] }
   0xc   :  { %89 = vmatpush.msra.mxu1 %v74_v8 }
   0xe   :  { %90 = vmatpush.msra.mxu1 %v73_v9 }
  0x10   :  { %91 = vmatpush.msra.mxu1 %v72_v10 }
  0x12   :  { %92 = vmatpush.msra.mxu1 %v71_v11 }
  0x14   :  { %93 = vmatpush.msra.mxu1 %v70_v12 }
  0x16   :  { %94 = vmatpush.msra.mxu1 %v69_v13 }
  0x18   :  { %95 = vmatpush.msra.mxu1 %v68_v14 }
  0x1a   :  { %96 = vmatpush.msra.mxu1 %v67_v15 }
  0x1c   :  { %97 = vmatpush.msra.mxu1 %v66_v16 }
  0x1e   :  { %98 = vmatpush.msra.mxu1 %v65_v17 }
  0x20   :  { %99 = vmatpush.msra.mxu1 %v64_v18 }
  0x82   :  { %v60_v20 = vpop.f32.mrf.mxu0 }
  0x83   :  { %v61_v21 = vadd.f32 %v127_v19, %v60_v20 }
  0x85   :  { %v63_v22 = vmax.f32 %v61_v21, 0.0 }
  0x87   :  { %100 = vmatmul.f32.vlgmr.msra.gmra.mxu1 %v63_v22 }
 0x104   :  { %v101_v25 = vpop.f32.mrf.mxu1 }
 0x105   :  { %v102_v26 = vadd.f32 %v128_v24, %v101_v25 }
 0x107   :  { %v104_v28 = vmax.f32 %v102_v26, 0.0 }
 0x109   :  { %v109_v29 = vmul.f32 %v129_v27, %v104_v28 }
 0x10b   :  { %v111_v30 = vsel %vm110_vm2, %v109_v29, 0.0 }
 0x10c   :  { %112 = vadd.xlane.f32.xlu0 %v111_v30 }
 0x17f   :  { %v113_v32 = vpop.xlane.xlu0 %112 }
 0x180   :  { %v118_v33 = vadd.f32 %v130_v31, %v113_v32 }
 0x182   :  { %120 = vst.msk [vmem:[%s250_s7] sm:$0xff] %vm119_vm3, %v118_v33 }

</bundles_post_ra>
